<compile_context>
chip_gen: v6e
topology: v6e:2x2x1
jax: 0.10.0
libtpu: 0.0.40
codegen_flags: <defaults>
</compile_context>

<pallas_src>
import math

import jax
import jax.numpy as jnp
from jax.experimental import pallas as pl
from jax.experimental.pallas import tpu as pltpu

# ------------------------- configuration (small, synthetic) ------------------
B, T = 2, 8
N_EMBD = 32          # n_embd
N_ATTN = 32          # n_attn
N_HEAD = 4           # n_head
CTX_LEN = 16         # ctx_len (>= T)
HS = N_ATTN // N_HEAD            # head_size = 8
ROT = int(HS * 0.5)              # rotary_ndims = 4


# ------------------------------- Pallas kernel -------------------------------
def mha_pro_kernel(x_ref,                       # (B, T, C)  time-shifted input
                   wq_ref, bq_ref,              # (C, A), (1, A)  * 1/sqrt(HS)
                   wqp_ref, bqp_ref,            # rotate_half-folded, * 1/sqrt(HS)
                   wk_ref, bk_ref,
                   wkp_ref, bkp_ref,
                   wv_ref, bv_ref,
                   cos_ref, sin_ref,            # (T, A) full-width rotary tables
                   w_ref,                       # (H*T, T)  stacked time-weight map
                   mask_ref,                    # (H*T, A)  block-diag head selection
                   hmc_ref,                     # (H, 1, A) head_mix expanded on lanes
                   wo_ref, bo_ref,              # (A, Cpad), (1, Cpad)  zero-padded
                   gamma_ref,                   # (T, 1)
                   o_ref,                       # (B*T, Cpad) lane-dense output slab
                   q_s, k_s, v_s):              # VMEM scratch, (B*T, A) each
    Bb, T_, C = x_ref.shape
    A = wq_ref.shape[1]
    HT = w_ref.shape[0]
    H = HT // T_
    f32 = jnp.float32

    x = x_ref[...].reshape(Bb * T_, C)          # leading-dim merge (layout no-op)

    def proj(w_r, b_r):
        # TODO(synk): at production shapes cast the MXU operands to bf16
        # (keep preferred_element_type=f32); the toy kernel is latency-bound.
        return jnp.dot(x, w_r[...], preferred_element_type=f32) + b_r[...]

    cos = jnp.tile(cos_ref[...], (Bb, 1))       # broadcast (T, A) table in-kernel
    sin = jnp.tile(sin_ref[...], (Bb, 1))

    # rotary + q-scale folded into weights -> 2 extra MXU matmuls + full-width FMAs
    q_s[...] = proj(wq_ref, bq_ref) * cos + proj(wqp_ref, bqp_ref) * sin
    k_s[...] = proj(wk_ref, bk_ref) * cos + proj(wkp_ref, bkp_ref) * sin
    v_s[...] = proj(wv_ref, bv_ref)

    w2d = w_ref[...]
    mask = mask_ref[...]
    hmc = hmc_ref[...]
    wo = wo_ref[...]
    bo = bo_ref[...]
    gamma = gamma_ref[...]

    def batch_body(b, carry):
        off = pl.multiple_of(b * T_, T_)
        qb = q_s[pl.ds(off, T_), :]              # (T, A)
        kb = k_s[pl.ds(off, T_), :]
        vb = v_s[pl.ds(off, T_), :]

        # Head-stacked scores: row (h*T + t), col s -> one (HT,A)x(T,A)^T MXU op.
        # TODO(synk): for head_size >= 64 switch to per-head (T,HS)@(HS,T)
        # matmuls; the masked-stack trick wastes MACs once HS ~ MXU tile size.
        qs = jnp.tile(qb, (H, 1)) * mask                          # (HT, A)
        s = jax.lax.dot_general(qs, kb, (((1,), (1,)), ((), ())),
                                preferred_element_type=f32)       # (HT, T)

        # softmax over the key dimension (per stacked row)
        s = s - jnp.max(s, axis=-1, keepdims=True)
        e = jnp.exp(s)
        p = e * pl.reciprocal(jnp.sum(e, axis=-1, keepdims=True), approx=True)
        att = p * w2d                                             # time weighting

        # AV against ALL heads' V columns; then head_mix + head-select +
        # cross-head reduce fused into H row-broadcast FMAs (pure VPU).
        avw = jnp.dot(att, vb, preferred_element_type=f32)        # (HT, A)
        y = jnp.sum(avw.reshape(H, T_, A) * hmc, axis=0)          # (T, A)

        out = jnp.dot(y, wo, preferred_element_type=f32) + bo     # (T, Cpad)
        o_ref[pl.ds(off, T_), :] = (out * gamma).astype(o_ref.dtype)
        return carry

    jax.lax.fori_loop(0, Bb, batch_body, 0, unroll=True)


# ------------------------------ wrapper (glue) --------------------------------
def mha_pro_forward(x, params):
    Bx, Tx, C = x.shape
    TT = CTX_LEN
    H, A = N_HEAD, N_ATTN
    scale = 1.0 / math.sqrt(HS)
    f32 = jnp.float32

    # ---- relative time-weight map w (pure index shuffling -> host JAX) ----
    tw = jnp.pad(params['time_w'], ((0, 0), (0, TT)))
    tw = jnp.tile(tw, (1, TT))
    tw = tw[:, :-TT].reshape(H, TT, 2 * TT - 1)[:, :, TT - 1:]
    w = (tw[:, :Tx, :Tx]
         * params['time_alpha'][:, :, :Tx]
         * params['time_beta'][:, :Tx, :])                         # (H, T, T)
    w2d = w.reshape(H * Tx, Tx)
    # TODO(synk): at production T, reconstruct w inside the kernel from the three
    # O(T) vectors instead of shipping the O(H*T^2) map (matters on v7x VMEM).

    # ---- time shift on the first half of the channels (ZeroPad2d((0,0,1,-1))) ----
    half = C // 2
    shifted = jnp.pad(x[:, :, :half], ((0, 0), (1, 0), (0, 0)))[:, :Tx, :]
    xs = jnp.concatenate([shifted, x[:, :, half:]], axis=-1)

    # ---- rotary tables widened to the full projection width (passed once) ----
    inv_freq = 1.0 / (CTX_LEN ** (jnp.arange(0, ROT, 2, dtype=f32) / ROT))
    t = jnp.arange(Tx, dtype=f32)
    freqs = jnp.einsum('i,j->ij', t, inv_freq)
    emb = jnp.concatenate([freqs, freqs], axis=-1)                 # (T, ROT)
    cos_h = jnp.concatenate([jnp.cos(emb), jnp.ones((Tx, HS - ROT), f32)], axis=-1)
    sin_h = jnp.concatenate([jnp.sin(emb), jnp.zeros((Tx, HS - ROT), f32)], axis=-1)
    cos_full = jnp.tile(cos_h, (1, H))                             # (T, A)
    sin_full = jnp.tile(sin_h, (1, H))

    # rotate_half as an exact (A, A) linear map (block-diagonal per head)
    hr = ROT // 2
    idx = jnp.arange(hr)
    R = jnp.zeros((HS, HS), f32)
    R = R.at[hr + idx, idx].set(-1.0)
    R = R.at[idx, hr + idx].set(1.0)
    P = jnp.kron(jnp.eye(H, dtype=f32), R)                         # (A, A)

    # fold rotary + 1/sqrt(HS) scale into the Q/K projection weights (q-side only)
    wq_s, bq_s = params['wq'] * scale, params['bq'] * scale
    wqp_s, bqp_s = (params['wq'] @ P) * scale, (params['bq'] @ P) * scale
    wk_s, bk_s = params['wk'], params['bk']
    wkp_s, bkp_s = params['wk'] @ P, params['bk'] @ P

    # block-diagonal head-selection mask (for the stacked-score trick) and the
    # head_mix matrix expanded across lanes: hmc[h, a] = head_mix[a // HS, h]
    mask = jnp.kron(jnp.eye(H, dtype=f32), jnp.ones((Tx, HS), f32))    # (H*T, A)
    hmc = jnp.repeat(params['head_mix'].T, HS, axis=1).reshape(H, 1, A)

    gamma = params['time_gamma'][:Tx, :]                               # (T, 1)

    # lane-dense output: pad wo / bo up to a multiple of 128 output lanes
    C_pad = max(128, ((C + 127) // 128) * 128)
    wo_pad = jnp.pad(params['wo'], ((0, 0), (0, C_pad - C)))
    bo_pad = jnp.pad(params['bo'], ((0, 0), (0, C_pad - C)))

    def full(arr):
        r = arr.ndim
        return pl.BlockSpec(arr.shape, lambda i, r=r: (0,) * r)

    out2 = pl.pallas_call(
        mha_pro_kernel,
        out_shape=jax.ShapeDtypeStruct((Bx * Tx, C_pad), x.dtype),
        # Single fused grid step: at these shapes per-step overhead dominates.
        # TODO(synk): at production batch/T split the batch over a grid axis
        # with core-parallel semantics (pltpu.CORE_PARALLEL / pl.core_map).
        grid=(1,),
        in_specs=[
            pl.BlockSpec((Bx, Tx, C), lambda i: (0, 0, 0)),            # x (shifted)
            full(wq_s), full(bq_s), full(wqp_s), full(bqp_s),
            full(wk_s), full(bk_s), full(wkp_s), full(bkp_s),
            full(params['wv']), full(params['bv']),
            full(cos_full), full(sin_full),
            full(w2d), full(mask), full(hmc),
            full(wo_pad), full(bo_pad),
            full(gamma),
        ],
        out_specs=pl.BlockSpec((Bx * Tx, C_pad), lambda i: (0, 0)),
        scratch_shapes=[pltpu.VMEM((Bx * Tx, A), f32)] * 3,            # q, k, v slabs
    )(xs, wq_s, bq_s, wqp_s, bqp_s, wk_s, bk_s, wkp_s, bkp_s,
      params['wv'], params['bv'], cos_full, sin_full, w2d, mask, hmc,
      wo_pad, bo_pad, gamma)

    return out2.reshape(Bx, Tx, C_pad)[..., :C]


# --------------------------- pure-JAX reference -------------------------------
def mha_pro_reference(x, params):
    Bx, Tx, C = x.shape
    TT = CTX_LEN
    tw = jnp.pad(params['time_w'], ((0, 0), (0, TT)))
    tw = jnp.tile(tw, (1, TT))
    tw = tw[:, :-TT].reshape(N_HEAD, TT, 2 * TT - 1)[:, :, TT - 1:]
    w = (tw[:, :Tx, :Tx]
         * params['time_alpha'][:, :, :Tx]
         * params['time_beta'][:, :Tx, :])

    half = C // 2
    shifted = jnp.pad(x[:, :, :half], ((0, 0), (1, 0), (0, 0)))[:, :Tx, :]
    xs = jnp.concatenate([shifted, x[:, :, half:]], axis=-1)

    q = (xs @ params['wq'] + params['bq']).reshape(Bx, Tx, N_HEAD, HS).transpose(0, 2, 1, 3)
    k = (xs @ params['wk'] + params['bk']).reshape(Bx, Tx, N_HEAD, HS).transpose(0, 2, 1, 3)
    v = (xs @ params['wv'] + params['bv']).reshape(Bx, Tx, N_HEAD, HS).transpose(0, 2, 1, 3)

    inv_freq = 1.0 / (CTX_LEN ** (jnp.arange(0, ROT, 2, dtype=jnp.float32) / ROT))
    t = jnp.arange(Tx, dtype=jnp.float32)
    emb = jnp.concatenate([jnp.outer(t, inv_freq)] * 2, axis=-1)
    cos, sin = jnp.cos(emb), jnp.sin(emb)

    def rot_half(a):
        return jnp.concatenate([-a[..., ROT // 2:], a[..., :ROT // 2]], axis=-1)

    qr, qp = q[..., :ROT], q[..., ROT:]
    kr, kp = k[..., :ROT], k[..., ROT:]
    qr = qr * cos + rot_half(qr) * sin
    kr = kr * cos + rot_half(kr) * sin
    q = jnp.concatenate([qr, qp], axis=-1)
    k = jnp.concatenate([kr, kp], axis=-1)

    att = jnp.einsum('bhtd,bhsd->bhts', q, k) / math.sqrt(HS)
    att = jax.nn.softmax(att, axis=-1)
    att = att * w[None]
    att = jnp.einsum('gh,bhts->bgts', params['head_mix'], att)
    y = jnp.einsum('bhts,bhsd->bhtd', att, v)
    y = y.transpose(0, 2, 1, 3).reshape(Bx, Tx, N_ATTN)
    return (y @ params['wo'] + params['bo']) * params['time_gamma'][:Tx, :]


# ------------------------------------ main ------------------------------------
if __name__ == "__main__":
    key = jax.random.PRNGKey(0)
    ks = jax.random.split(key, 16)

    params = {
        'time_w':     1.0 + 0.1 * jax.random.normal(ks[0], (N_HEAD, CTX_LEN), jnp.float32),
        'time_alpha': 1.0 + 0.1 * jax.random.normal(ks[1], (N_HEAD, 1, CTX_LEN), jnp.float32),
        'time_beta':  1.0 + 0.1 * jax.random.normal(ks[2], (N_HEAD, CTX_LEN, 1), jnp.float32),
        'time_gamma': 1.0 + 0.1 * jax.random.normal(ks[3], (CTX_LEN, 1), jnp.float32),
        'wq': 0.1 * jax.random.normal(ks[4], (N_EMBD, N_ATTN), jnp.float32),
        'bq': 0.1 * jax.random.normal(ks[5], (1, N_ATTN), jnp.float32),
        'wk': 0.1 * jax.random.normal(ks[6], (N_EMBD, N_ATTN), jnp.float32),
        'bk': 0.1 * jax.random.normal(ks[7], (1, N_ATTN), jnp.float32),
        'wv': 0.1 * jax.random.normal(ks[8], (N_EMBD, N_ATTN), jnp.float32),
        'bv': 0.1 * jax.random.normal(ks[9], (1, N_ATTN), jnp.float32),
        'head_mix': 0.3 * jax.random.normal(ks[10], (N_HEAD, N_HEAD), jnp.float32),
        'wo': 0.1 * jax.random.normal(ks[11], (N_ATTN, N_EMBD), jnp.float32),
        'bo': 0.1 * jax.random.normal(ks[12], (1, N_EMBD), jnp.float32),
    }

    x = jax.random.normal(ks[15], (B, T, N_EMBD), jnp.float32)

    out = jax.block_until_ready(mha_pro_forward(x, params))
    ref = mha_pro_reference(x, params)
    err = float(jnp.max(jnp.abs(out - ref)))
    # tolerance loosened slightly vs 5e-4 to cover the EUP approx reciprocal
    # (rel-err ~2^-12) used for the softmax denominator
    assert jnp.allclose(out, ref, rtol=2e-3, atol=2e-3), f"max abs err = {err}"
    print("KERNEL_OK")
</pallas_src>

<mosaic_0001>
module attributes {stable_mosaic.version = 11 : i64} {
  func.func @mha_pro_kernel(%arg0: i32, %arg1: memref<2x8x32xf32, #tpu.memory_space<vmem>>, %arg2: memref<32x32xf32, #tpu.memory_space<vmem>>, %arg3: memref<1x32xf32, #tpu.memory_space<vmem>>, %arg4: memref<32x32xf32, #tpu.memory_space<vmem>>, %arg5: memref<1x32xf32, #tpu.memory_space<vmem>>, %arg6: memref<32x32xf32, #tpu.memory_space<vmem>>, %arg7: memref<1x32xf32, #tpu.memory_space<vmem>>, %arg8: memref<32x32xf32, #tpu.memory_space<vmem>>, %arg9: memref<1x32xf32, #tpu.memory_space<vmem>>, %arg10: memref<32x32xf32, #tpu.memory_space<vmem>>, %arg11: memref<1x32xf32, #tpu.memory_space<vmem>>, %arg12: memref<8x32xf32, #tpu.memory_space<vmem>>, %arg13: memref<8x32xf32, #tpu.memory_space<vmem>>, %arg14: memref<32x8xf32, #tpu.memory_space<vmem>>, %arg15: memref<32x32xf32, #tpu.memory_space<vmem>>, %arg16: memref<4x1x32xf32, #tpu.memory_space<vmem>>, %arg17: memref<32x128xf32, #tpu.memory_space<vmem>>, %arg18: memref<1x128xf32, #tpu.memory_space<vmem>>, %arg19: memref<8x1xf32, #tpu.memory_space<vmem>>, %arg20: memref<16x128xf32, #tpu.memory_space<vmem>>, %arg21: memref<16x32xf32, #tpu.memory_space<vmem>>, %arg22: memref<16x32xf32, #tpu.memory_space<vmem>>, %arg23: memref<16x32xf32, #tpu.memory_space<vmem>>) attributes {dimension_semantics = [#tpu.dimension_semantics<arbitrary>], iteration_bounds = array<i64: 1>, scalar_prefetch = 0 : i64, scratch_operands = 3 : i64, tpu.core_type = #tpu.core_type<tc>, window_params = [{pipeline_mode = #tpu.pipeline_mode<synchronous>, transform_indices = @transform_0, window_bounds = array<i64: 2, 8, 32>}, {pipeline_mode = #tpu.pipeline_mode<synchronous>, transform_indices = @transform_1, window_bounds = array<i64: 32, 32>}, {pipeline_mode = #tpu.pipeline_mode<synchronous>, transform_indices = @transform_2, window_bounds = array<i64: 1, 32>}, {pipeline_mode = #tpu.pipeline_mode<synchronous>, transform_indices = @transform_3, window_bounds = array<i64: 32, 32>}, {pipeline_mode = #tpu.pipeline_mode<synchronous>, transform_indices = @transform_4, window_bounds = array<i64: 1, 32>}, {pipeline_mode = #tpu.pipeline_mode<synchronous>, transform_indices = @transform_5, window_bounds = array<i64: 32, 32>}, {pipeline_mode = #tpu.pipeline_mode<synchronous>, transform_indices = @transform_6, window_bounds = array<i64: 1, 32>}, {pipeline_mode = #tpu.pipeline_mode<synchronous>, transform_indices = @transform_7, window_bounds = array<i64: 32, 32>}, {pipeline_mode = #tpu.pipeline_mode<synchronous>, transform_indices = @transform_8, window_bounds = array<i64: 1, 32>}, {pipeline_mode = #tpu.pipeline_mode<synchronous>, transform_indices = @transform_9, window_bounds = array<i64: 32, 32>}, {pipeline_mode = #tpu.pipeline_mode<synchronous>, transform_indices = @transform_10, window_bounds = array<i64: 1, 32>}, {pipeline_mode = #tpu.pipeline_mode<synchronous>, transform_indices = @transform_11, window_bounds = array<i64: 8, 32>}, {pipeline_mode = #tpu.pipeline_mode<synchronous>, transform_indices = @transform_12, window_bounds = array<i64: 8, 32>}, {pipeline_mode = #tpu.pipeline_mode<synchronous>, transform_indices = @transform_13, window_bounds = array<i64: 32, 8>}, {pipeline_mode = #tpu.pipeline_mode<synchronous>, transform_indices = @transform_14, window_bounds = array<i64: 32, 32>}, {pipeline_mode = #tpu.pipeline_mode<synchronous>, transform_indices = @transform_15, window_bounds = array<i64: 4, 1, 32>}, {pipeline_mode = #tpu.pipeline_mode<synchronous>, transform_indices = @transform_16, window_bounds = array<i64: 32, 128>}, {pipeline_mode = #tpu.pipeline_mode<synchronous>, transform_indices = @transform_17, window_bounds = array<i64: 1, 128>}, {pipeline_mode = #tpu.pipeline_mode<synchronous>, transform_indices = @transform_18, window_bounds = array<i64: 8, 1>}, {pipeline_mode = #tpu.pipeline_mode<synchronous>, transform_indices = @transform_19, window_bounds = array<i64: 16, 128>}]} {
    %c0 = arith.constant 0 : index
    %c0_0 = arith.constant 0 : index
    %c0_1 = arith.constant 0 : index
    %0 = vector.load %arg1[%c0, %c0_0, %c0_1] : memref<2x8x32xf32, #tpu.memory_space<vmem>>, vector<2x8x32xf32>
    %1 = vector.shape_cast %0 : vector<2x8x32xf32> to vector<16x32xf32>
    %c0_2 = arith.constant 0 : index
    %c0_3 = arith.constant 0 : index
    %2 = vector.load %arg12[%c0_2, %c0_3] : memref<8x32xf32, #tpu.memory_space<vmem>>, vector<8x32xf32>
    %3 = tpu.concatenate %2, %2 in 0 : vector<8x32xf32>, vector<8x32xf32> -> vector<16x32xf32>
    %c0_4 = arith.constant 0 : index
    %c0_5 = arith.constant 0 : index
    %4 = vector.load %arg13[%c0_4, %c0_5] : memref<8x32xf32, #tpu.memory_space<vmem>>, vector<8x32xf32>
    %5 = tpu.concatenate %4, %4 in 0 : vector<8x32xf32>, vector<8x32xf32> -> vector<16x32xf32>
    %c0_6 = arith.constant 0 : index
    %c0_7 = arith.constant 0 : index
    %6 = vector.load %arg2[%c0_6, %c0_7] : memref<32x32xf32, #tpu.memory_space<vmem>>, vector<32x32xf32>
    %cst = arith.constant dense<0.000000e+00> : vector<16x32xf32>
    %7 = tpu.matmul %1, %6, %cst {dimension_numbers = #tpu.dot_dimension_numbers<[1], [0], [0], [1], [0, 0, 1, 1], [], []>} : vector<16x32xf32>, vector<32x32xf32>, vector<16x32xf32> -> vector<16x32xf32>
    %c0_8 = arith.constant 0 : index
    %c0_9 = arith.constant 0 : index
    %8 = vector.load %arg3[%c0_8, %c0_9] : memref<1x32xf32, #tpu.memory_space<vmem>>, vector<1x32xf32>
    %9 = vector.broadcast %8 : vector<1x32xf32> to vector<16x32xf32>
    %10 = arith.addf %7, %9 : vector<16x32xf32>
    %11 = arith.mulf %10, %3 : vector<16x32xf32>
    %c0_10 = arith.constant 0 : index
    %c0_11 = arith.constant 0 : index
    %12 = vector.load %arg4[%c0_10, %c0_11] : memref<32x32xf32, #tpu.memory_space<vmem>>, vector<32x32xf32>
    %cst_12 = arith.constant dense<0.000000e+00> : vector<16x32xf32>
    %13 = tpu.matmul %1, %12, %cst_12 {dimension_numbers = #tpu.dot_dimension_numbers<[1], [0], [0], [1], [0, 0, 1, 1], [], []>} : vector<16x32xf32>, vector<32x32xf32>, vector<16x32xf32> -> vector<16x32xf32>
    %c0_13 = arith.constant 0 : index
    %c0_14 = arith.constant 0 : index
    %14 = vector.load %arg5[%c0_13, %c0_14] : memref<1x32xf32, #tpu.memory_space<vmem>>, vector<1x32xf32>
    %15 = vector.broadcast %14 : vector<1x32xf32> to vector<16x32xf32>
    %16 = arith.addf %13, %15 : vector<16x32xf32>
    %17 = arith.mulf %16, %5 : vector<16x32xf32>
    %18 = arith.addf %11, %17 : vector<16x32xf32>
    %c0_15 = arith.constant 0 : index
    %c0_16 = arith.constant 0 : index
    %19 = vector.load %arg21[%c0_15, %c0_16] : memref<16x32xf32, #tpu.memory_space<vmem>>, vector<16x32xf32>
    tpu.vector_store %arg21[%c0_15, %c0_16], %18 {strides = array<i32>} : memref<16x32xf32, #tpu.memory_space<vmem>>, vector<16x32xf32>,
    %c0_17 = arith.constant 0 : index
    %c0_18 = arith.constant 0 : index
    %20 = vector.load %arg6[%c0_17, %c0_18] : memref<32x32xf32, #tpu.memory_space<vmem>>, vector<32x32xf32>
    %cst_19 = arith.constant dense<0.000000e+00> : vector<16x32xf32>
    %21 = tpu.matmul %1, %20, %cst_19 {dimension_numbers = #tpu.dot_dimension_numbers<[1], [0], [0], [1], [0, 0, 1, 1], [], []>} : vector<16x32xf32>, vector<32x32xf32>, vector<16x32xf32> -> vector<16x32xf32>
    %c0_20 = arith.constant 0 : index
    %c0_21 = arith.constant 0 : index
    %22 = vector.load %arg7[%c0_20, %c0_21] : memref<1x32xf32, #tpu.memory_space<vmem>>, vector<1x32xf32>
    %23 = vector.broadcast %22 : vector<1x32xf32> to vector<16x32xf32>
    %24 = arith.addf %21, %23 : vector<16x32xf32>
    %25 = arith.mulf %24, %3 : vector<16x32xf32>
    %c0_22 = arith.constant 0 : index
    %c0_23 = arith.constant 0 : index
    %26 = vector.load %arg8[%c0_22, %c0_23] : memref<32x32xf32, #tpu.memory_space<vmem>>, vector<32x32xf32>
    %cst_24 = arith.constant dense<0.000000e+00> : vector<16x32xf32>
    %27 = tpu.matmul %1, %26, %cst_24 {dimension_numbers = #tpu.dot_dimension_numbers<[1], [0], [0], [1], [0, 0, 1, 1], [], []>} : vector<16x32xf32>, vector<32x32xf32>, vector<16x32xf32> -> vector<16x32xf32>
    %c0_25 = arith.constant 0 : index
    %c0_26 = arith.constant 0 : index
    %28 = vector.load %arg9[%c0_25, %c0_26] : memref<1x32xf32, #tpu.memory_space<vmem>>, vector<1x32xf32>
    %29 = vector.broadcast %28 : vector<1x32xf32> to vector<16x32xf32>
    %30 = arith.addf %27, %29 : vector<16x32xf32>
    %31 = arith.mulf %30, %5 : vector<16x32xf32>
    %32 = arith.addf %25, %31 : vector<16x32xf32>
    %c0_27 = arith.constant 0 : index
    %c0_28 = arith.constant 0 : index
    %33 = vector.load %arg22[%c0_27, %c0_28] : memref<16x32xf32, #tpu.memory_space<vmem>>, vector<16x32xf32>
    tpu.vector_store %arg22[%c0_27, %c0_28], %32 {strides = array<i32>} : memref<16x32xf32, #tpu.memory_space<vmem>>, vector<16x32xf32>,
    %c0_29 = arith.constant 0 : index
    %c0_30 = arith.constant 0 : index
    %34 = vector.load %arg10[%c0_29, %c0_30] : memref<32x32xf32, #tpu.memory_space<vmem>>, vector<32x32xf32>
    %cst_31 = arith.constant dense<0.000000e+00> : vector<16x32xf32>
    %35 = tpu.matmul %1, %34, %cst_31 {dimension_numbers = #tpu.dot_dimension_numbers<[1], [0], [0], [1], [0, 0, 1, 1], [], []>} : vector<16x32xf32>, vector<32x32xf32>, vector<16x32xf32> -> vector<16x32xf32>
    %c0_32 = arith.constant 0 : index
    %c0_33 = arith.constant 0 : index
    %36 = vector.load %arg11[%c0_32, %c0_33] : memref<1x32xf32, #tpu.memory_space<vmem>>, vector<1x32xf32>
    %37 = vector.broadcast %36 : vector<1x32xf32> to vector<16x32xf32>
    %38 = arith.addf %35, %37 : vector<16x32xf32>
    %c0_34 = arith.constant 0 : index
    %c0_35 = arith.constant 0 : index
    %39 = vector.load %arg23[%c0_34, %c0_35] : memref<16x32xf32, #tpu.memory_space<vmem>>, vector<16x32xf32>
    tpu.vector_store %arg23[%c0_34, %c0_35], %38 {strides = array<i32>} : memref<16x32xf32, #tpu.memory_space<vmem>>, vector<16x32xf32>,
    %c0_36 = arith.constant 0 : index
    %c0_37 = arith.constant 0 : index
    %40 = vector.load %arg14[%c0_36, %c0_37] : memref<32x8xf32, #tpu.memory_space<vmem>>, vector<32x8xf32>
    %c0_38 = arith.constant 0 : index
    %c0_39 = arith.constant 0 : index
    %41 = vector.load %arg15[%c0_38, %c0_39] : memref<32x32xf32, #tpu.memory_space<vmem>>, vector<32x32xf32>
    %c0_40 = arith.constant 0 : index
    %c0_41 = arith.constant 0 : index
    %c0_42 = arith.constant 0 : index
    %42 = vector.load %arg16[%c0_40, %c0_41, %c0_42] : memref<4x1x32xf32, #tpu.memory_space<vmem>>, vector<4x1x32xf32>
    %c0_43 = arith.constant 0 : index
    %c0_44 = arith.constant 0 : index
    %43 = vector.load %arg17[%c0_43, %c0_44] : memref<32x128xf32, #tpu.memory_space<vmem>>, vector<32x128xf32>
    %c0_45 = arith.constant 0 : index
    %c0_46 = arith.constant 0 : index
    %44 = vector.load %arg18[%c0_45, %c0_46] : memref<1x128xf32, #tpu.memory_space<vmem>>, vector<1x128xf32>
    %c0_47 = arith.constant 0 : index
    %c0_48 = arith.constant 0 : index
    %45 = vector.load %arg19[%c0_47, %c0_48] : memref<8x1xf32, #tpu.memory_space<vmem>>, vector<8x1xf32>
    %c0_i32 = arith.constant 0 : i32
    %c8_i32 = arith.constant 8 : i32
    %46 = arith.muli %c0_i32, %c8_i32 : i32
    %47 = tpu.assume_multiple %46, 8 : i32
    %48 = arith.index_cast %47 : i32 to index
    %c0_49 = arith.constant 0 : index
    %49 = vector.load %arg21[%48, %c0_49] : memref<16x32xf32, #tpu.memory_space<vmem>>, vector<8x32xf32>
    %50 = arith.index_cast %47 : i32 to index
    %c0_50 = arith.constant 0 : index
    %51 = vector.load %arg22[%50, %c0_50] : memref<16x32xf32, #tpu.memory_space<vmem>>, vector<8x32xf32>
    %52 = arith.index_cast %47 : i32 to index
    %c0_51 = arith.constant 0 : index
    %53 = vector.load %arg23[%52, %c0_51] : memref<16x32xf32, #tpu.memory_space<vmem>>, vector<8x32xf32>
    %54 = tpu.concatenate %49, %49, %49, %49 in 0 : vector<8x32xf32>, vector<8x32xf32>, vector<8x32xf32>, vector<8x32xf32> -> vector<32x32xf32>
    %55 = arith.mulf %54, %41 : vector<32x32xf32>
    %cst_52 = arith.constant dense<0.000000e+00> : vector<32x8xf32>
    %56 = tpu.matmul %55, %51, %cst_52 {dimension_numbers = #tpu.dot_dimension_numbers<[1], [1], [0], [0], [0, 0, 1, 0], [], []>} : vector<32x32xf32>, vector<8x32xf32>, vector<32x8xf32> -> vector<32x8xf32>
    %cst_53 = arith.constant dense<0xFF800000> : vector<32xf32>
    %57 = vector.multi_reduction <maximumf>, %56, %cst_53 [1] : vector<32x8xf32> to vector<32xf32>
    %58 = vector.shape_cast %57 : vector<32xf32> to vector<32x1xf32>
    %59 = vector.broadcast %58 : vector<32x1xf32> to vector<32x8xf32>
    %60 = arith.subf %56, %59 : vector<32x8xf32>
    %61 = math.exp %60 : vector<32x8xf32>
    %cst_54 = arith.constant dense<0.000000e+00> : vector<32xf32>
    %62 = vector.multi_reduction <add>, %61, %cst_54 [1] : vector<32x8xf32> to vector<32xf32>
    %63 = vector.shape_cast %62 : vector<32xf32> to vector<32x1xf32>
    %64 = tpu.reciprocal %63 {approx = true} : vector<32x1xf32> -> vector<32x1xf32>
    %65 = vector.broadcast %64 : vector<32x1xf32> to vector<32x8xf32>
    %66 = arith.mulf %61, %65 : vector<32x8xf32>
    %67 = arith.mulf %66, %40 : vector<32x8xf32>
    %cst_55 = arith.constant dense<0.000000e+00> : vector<32x32xf32>
    %68 = tpu.matmul %67, %53, %cst_55 {dimension_numbers = #tpu.dot_dimension_numbers<[1], [0], [0], [1], [0, 0, 1, 1], [], []>} : vector<32x8xf32>, vector<8x32xf32>, vector<32x32xf32> -> vector<32x32xf32>
    %69 = vector.shape_cast %68 : vector<32x32xf32> to vector<4x8x32xf32>
    %70 = vector.broadcast %42 : vector<4x1x32xf32> to vector<4x8x32xf32>
    %71 = arith.mulf %69, %70 : vector<4x8x32xf32>
    %cst_56 = arith.constant dense<0.000000e+00> : vector<8x32xf32>
    %72 = vector.multi_reduction <add>, %71, %cst_56 [0] : vector<4x8x32xf32> to vector<8x32xf32>
    %cst_57 = arith.constant dense<0.000000e+00> : vector<8x128xf32>
    %73 = tpu.matmul %72, %43, %cst_57 {dimension_numbers = #tpu.dot_dimension_numbers<[1], [0], [0], [1], [0, 0, 1, 1], [], []>} : vector<8x32xf32>, vector<32x128xf32>, vector<8x128xf32> -> vector<8x128xf32>
    %74 = vector.broadcast %44 : vector<1x128xf32> to vector<8x128xf32>
    %75 = arith.addf %73, %74 : vector<8x128xf32>
    %76 = vector.broadcast %45 : vector<8x1xf32> to vector<8x128xf32>
    %77 = arith.mulf %75, %76 : vector<8x128xf32>
    %78 = arith.index_cast %47 : i32 to index
    %c0_58 = arith.constant 0 : index
    %79 = vector.load %arg20[%78, %c0_58] : memref<16x128xf32, #tpu.memory_space<vmem>>, vector<8x128xf32>
    tpu.vector_store %arg20[%78, %c0_58], %77 {strides = array<i32>} : memref<16x128xf32, #tpu.memory_space<vmem>>, vector<8x128xf32>,
    %c1_i32 = arith.constant 1 : i32
    %c8_i32_59 = arith.constant 8 : i32
    %80 = arith.muli %c1_i32, %c8_i32_59 : i32
    %81 = tpu.assume_multiple %80, 8 : i32
    %82 = arith.index_cast %81 : i32 to index
    %c0_60 = arith.constant 0 : index
    %83 = vector.load %arg21[%82, %c0_60] : memref<16x32xf32, #tpu.memory_space<vmem>>, vector<8x32xf32>
    %84 = arith.index_cast %81 : i32 to index
    %c0_61 = arith.constant 0 : index
    %85 = vector.load %arg22[%84, %c0_61] : memref<16x32xf32, #tpu.memory_space<vmem>>, vector<8x32xf32>
    %86 = arith.index_cast %81 : i32 to index
    %c0_62 = arith.constant 0 : index
    %87 = vector.load %arg23[%86, %c0_62] : memref<16x32xf32, #tpu.memory_space<vmem>>, vector<8x32xf32>
    %88 = tpu.concatenate %83, %83, %83, %83 in 0 : vector<8x32xf32>, vector<8x32xf32>, vector<8x32xf32>, vector<8x32xf32> -> vector<32x32xf32>
    %89 = arith.mulf %88, %41 : vector<32x32xf32>
    %cst_63 = arith.constant dense<0.000000e+00> : vector<32x8xf32>
    %90 = tpu.matmul %89, %85, %cst_63 {dimension_numbers = #tpu.dot_dimension_numbers<[1], [1], [0], [0], [0, 0, 1, 0], [], []>} : vector<32x32xf32>, vector<8x32xf32>, vector<32x8xf32> -> vector<32x8xf32>
    %cst_64 = arith.constant dense<0xFF800000> : vector<32xf32>
    %91 = vector.multi_reduction <maximumf>, %90, %cst_64 [1] : vector<32x8xf32> to vector<32xf32>
    %92 = vector.shape_cast %91 : vector<32xf32> to vector<32x1xf32>
    %93 = vector.broadcast %92 : vector<32x1xf32> to vector<32x8xf32>
    %94 = arith.subf %90, %93 : vector<32x8xf32>
    %95 = math.exp %94 : vector<32x8xf32>
    %cst_65 = arith.constant dense<0.000000e+00> : vector<32xf32>
    %96 = vector.multi_reduction <add>, %95, %cst_65 [1] : vector<32x8xf32> to vector<32xf32>
    %97 = vector.shape_cast %96 : vector<32xf32> to vector<32x1xf32>
    %98 = tpu.reciprocal %97 {approx = true} : vector<32x1xf32> -> vector<32x1xf32>
    %99 = vector.broadcast %98 : vector<32x1xf32> to vector<32x8xf32>
    %100 = arith.mulf %95, %99 : vector<32x8xf32>
    %101 = arith.mulf %100, %40 : vector<32x8xf32>
    %cst_66 = arith.constant dense<0.000000e+00> : vector<32x32xf32>
    %102 = tpu.matmul %101, %87, %cst_66 {dimension_numbers = #tpu.dot_dimension_numbers<[1], [0], [0], [1], [0, 0, 1, 1], [], []>} : vector<32x8xf32>, vector<8x32xf32>, vector<32x32xf32> -> vector<32x32xf32>
    %103 = vector.shape_cast %102 : vector<32x32xf32> to vector<4x8x32xf32>
    %104 = vector.broadcast %42 : vector<4x1x32xf32> to vector<4x8x32xf32>
    %105 = arith.mulf %103, %104 : vector<4x8x32xf32>
    %cst_67 = arith.constant dense<0.000000e+00> : vector<8x32xf32>
    %106 = vector.multi_reduction <add>, %105, %cst_67 [0] : vector<4x8x32xf32> to vector<8x32xf32>
    %cst_68 = arith.constant dense<0.000000e+00> : vector<8x128xf32>
    %107 = tpu.matmul %106, %43, %cst_68 {dimension_numbers = #tpu.dot_dimension_numbers<[1], [0], [0], [1], [0, 0, 1, 1], [], []>} : vector<8x32xf32>, vector<32x128xf32>, vector<8x128xf32> -> vector<8x128xf32>
    %108 = vector.broadcast %44 : vector<1x128xf32> to vector<8x128xf32>
    %109 = arith.addf %107, %108 : vector<8x128xf32>
    %110 = vector.broadcast %45 : vector<8x1xf32> to vector<8x128xf32>
    %111 = arith.mulf %109, %110 : vector<8x128xf32>
    %112 = arith.index_cast %81 : i32 to index
    %c0_69 = arith.constant 0 : index
    %113 = vector.load %arg20[%112, %c0_69] : memref<16x128xf32, #tpu.memory_space<vmem>>, vector<8x128xf32>
    tpu.vector_store %arg20[%112, %c0_69], %111 {strides = array<i32>} : memref<16x128xf32, #tpu.memory_space<vmem>>, vector<8x128xf32>,
    %c2_i32 = arith.constant 2 : i32
    return
  }
  func.func @transform_0(%arg0: i32) -> (i32, i32, i32) {
    %c0_i32 = arith.constant 0 : i32
    %c0_i32_0 = arith.constant 0 : i32
    %c0_i32_1 = arith.constant 0 : i32
    %c0_i32_2 = arith.constant 0 : i32
    return %c0_i32, %c0_i32_0, %c0_i32_1 : i32, i32, i32
  }
  func.func @transform_1(%arg0: i32) -> (i32, i32) {
    %c0_i32 = arith.constant 0 : i32
    %c0_i32_0 = arith.constant 0 : i32
    %c0_i32_1 = arith.constant 0 : i32
    return %c0_i32, %c0_i32_0 : i32, i32
  }
  func.func @transform_2(%arg0: i32) -> (i32, i32) {
    %c0_i32 = arith.constant 0 : i32
    %c0_i32_0 = arith.constant 0 : i32
    %c0_i32_1 = arith.constant 0 : i32
    return %c0_i32, %c0_i32_0 : i32, i32
  }
  func.func @transform_3(%arg0: i32) -> (i32, i32) {
    %c0_i32 = arith.constant 0 : i32
    %c0_i32_0 = arith.constant 0 : i32
    %c0_i32_1 = arith.constant 0 : i32
    return %c0_i32, %c0_i32_0 : i32, i32
  }
  func.func @transform_4(%arg0: i32) -> (i32, i32) {
    %c0_i32 = arith.constant 0 : i32
    %c0_i32_0 = arith.constant 0 : i32
    %c0_i32_1 = arith.constant 0 : i32
    return %c0_i32, %c0_i32_0 : i32, i32
  }
  func.func @transform_5(%arg0: i32) -> (i32, i32) {
    %c0_i32 = arith.constant 0 : i32
    %c0_i32_0 = arith.constant 0 : i32
    %c0_i32_1 = arith.constant 0 : i32
    return %c0_i32, %c0_i32_0 : i32, i32
  }
  func.func @transform_6(%arg0: i32) -> (i32, i32) {
    %c0_i32 = arith.constant 0 : i32
    %c0_i32_0 = arith.constant 0 : i32
    %c0_i32_1 = arith.constant 0 : i32
    return %c0_i32, %c0_i32_0 : i32, i32
  }
  func.func @transform_7(%arg0: i32) -> (i32, i32) {
    %c0_i32 = arith.constant 0 : i32
    %c0_i32_0 = arith.constant 0 : i32
    %c0_i32_1 = arith.constant 0 : i32
    return %c0_i32, %c0_i32_0 : i32, i32
  }
  func.func @transform_8(%arg0: i32) -> (i32, i32) {
    %c0_i32 = arith.constant 0 : i32
    %c0_i32_0 = arith.constant 0 : i32
    %c0_i32_1 = arith.constant 0 : i32
    return %c0_i32, %c0_i32_0 : i32, i32
  }
  func.func @transform_9(%arg0: i32) -> (i32, i32) {
    %c0_i32 = arith.constant 0 : i32
    %c0_i32_0 = arith.constant 0 : i32
    %c0_i32_1 = arith.constant 0 : i32
    return %c0_i32, %c0_i32_0 : i32, i32
  }
  func.func @transform_10(%arg0: i32) -> (i32, i32) {
    %c0_i32 = arith.constant 0 : i32
    %c0_i32_0 = arith.constant 0 : i32
    %c0_i32_1 = arith.constant 0 : i32
    return %c0_i32, %c0_i32_0 : i32, i32
  }
  func.func @transform_11(%arg0: i32) -> (i32, i32) {
    %c0_i32 = arith.constant 0 : i32
    %c0_i32_0 = arith.constant 0 : i32
    %c0_i32_1 = arith.constant 0 : i32
    return %c0_i32, %c0_i32_0 : i32, i32
  }
  func.func @transform_12(%arg0: i32) -> (i32, i32) {
    %c0_i32 = arith.constant 0 : i32
    %c0_i32_0 = arith.constant 0 : i32
    %c0_i32_1 = arith.constant 0 : i32
    return %c0_i32, %c0_i32_0 : i32, i32
  }
  func.func @transform_13(%arg0: i32) -> (i32, i32) {
    %c0_i32 = arith.constant 0 : i32
    %c0_i32_0 = arith.constant 0 : i32
    %c0_i32_1 = arith.constant 0 : i32
    return %c0_i32, %c0_i32_0 : i32, i32
  }
  func.func @transform_14(%arg0: i32) -> (i32, i32) {
    %c0_i32 = arith.constant 0 : i32
    %c0_i32_0 = arith.constant 0 : i32
    %c0_i32_1 = arith.constant 0 : i32
    return %c0_i32, %c0_i32_0 : i32, i32
  }
  func.func @transform_15(%arg0: i32) -> (i32, i32, i32) {
    %c0_i32 = arith.constant 0 : i32
    %c0_i32_0 = arith.constant 0 : i32
    %c0_i32_1 = arith.constant 0 : i32
    %c0_i32_2 = arith.constant 0 : i32
    return %c0_i32, %c0_i32_0, %c0_i32_1 : i32, i32, i32
  }
  func.func @transform_16(%arg0: i32) -> (i32, i32) {
    %c0_i32 = arith.constant 0 : i32
    %c0_i32_0 = arith.constant 0 : i32
    %c0_i32_1 = arith.constant 0 : i32
    return %c0_i32, %c0_i32_0 : i32, i32
  }
  func.func @transform_17(%arg0: i32) -> (i32, i32) {
    %c0_i32 = arith.constant 0 : i32
    %c0_i32_0 = arith.constant 0 : i32
    %c0_i32_1 = arith.constant 0 : i32
    return %c0_i32, %c0_i32_0 : i32, i32
  }
  func.func @transform_18(%arg0: i32) -> (i32, i32) {
    %c0_i32 = arith.constant 0 : i32
    %c0_i32_0 = arith.constant 0 : i32
    %c0_i32_1 = arith.constant 0 : i32
    return %c0_i32, %c0_i32_0 : i32, i32
  }
  func.func @transform_19(%arg0: i32) -> (i32, i32) {
    %c0_i32 = arith.constant 0 : i32
    %c0_i32_0 = arith.constant 0 : i32
    %c0_i32_1 = arith.constant 0 : i32
    return %c0_i32, %c0_i32_0 : i32, i32
  }
}

</mosaic_0001>

<bundles_post_ra>
// kernel: tpu_custom_call.1
= control target key start
LH: loop header
LB: loop body
LE: loop exit
PB: predicated region body
PF: predicated region fallthrough
CT: control target
= control target key end

     0   :  { %s2383_s0 = inlined_call_operand.hbm [shape: f32[2,8,32], index: 0, kind: input, shape index: {}]   ;;  %s2384_s1 = inlined_call_operand.vmem [shape: f32[32,32], index: 1, kind: input, shape index: {}]   ;;  %s2385_s2 = inlined_call_operand.hbm [shape: f32[1,32], index: 2, kind: input, shape index: {}]   ;;  %s2386_s3 = inlined_call_operand.hbm [shape: f32[32,32], index: 3, kind: input, shape index: {}]   ;;  %s2387_s4 = inlined_call_operand.hbm [shape: f32[1,32], index: 4, kind: input, shape index: {}]   ;;  %s2388_s5 = inlined_call_operand.hbm [shape: f32[32,32], index: 5, kind: input, shape index: {}]   ;;  %s2389_s6 = inlined_call_operand.hbm [shape: f32[1,32], index: 6, kind: input, shape index: {}]   ;;  %s2390_s7 = inlined_call_operand.hbm [shape: f32[32,32], index: 7, kind: input, shape index: {}]   ;;  %s2391_s8 = inlined_call_operand.hbm [shape: f32[1,32], index: 8, kind: input, shape index: {}]   ;;  %s2392_s9 = inlined_call_operand.vmem [shape: f32[32,32], index: 9, kind: input, shape index: {}]   ;;  %s2393_s10 = inlined_call_operand.hbm [shape: f32[1,32], index: 10, kind: input, shape index: {}]   ;;  %s2394_s11 = inlined_call_operand.hbm [shape: f32[8,32], index: 11, kind: input, shape index: {}]   ;;  %s2395_s12 = inlined_call_operand.hbm [shape: f32[8,32], index: 12, kind: input, shape index: {}]   ;;  %s2396_s13 = inlined_call_operand.vmem [shape: f32[32,8], index: 13, kind: input, shape index: {}]   ;;  %s2397_s14 = inlined_call_operand.hbm [shape: f32[32,32], index: 14, kind: input, shape index: {}]   ;;  %s2398_s15 = inlined_call_operand.vmem [shape: f32[4,1,32], index: 15, kind: input, shape index: {}]   ;;  %s2399_s16 = inlined_call_operand.hbm [shape: f32[32,128], index: 16, kind: input, shape index: {}]   ;;  %s2400_s17 = inlined_call_operand.vmem [shape: f32[1,128], index: 17, kind: input, shape index: {}]   ;;  %s2401_s18 = inlined_call_operand.vmem [shape: f32[8,1], index: 18, kind: input, shape index: {}]   ;;  %s2402_s19 = inlined_call_operand.hbm [shape: f32[16,128], index: 19, kind: output, shape index: {}]  }
   0x1   :  { %2404 = sst [smem:[#allocation35_spill]] %s2383_s0 }
   0x2   :  { %2405 = sst [smem:[#allocation36_spill]] %s2384_s1 }
   0x3   :  { %2406 = sst [smem:[#allocation37_spill]] %s2385_s2 }
   0x4   :  { %2407 = sst [smem:[#allocation38_spill]] %s2386_s3 }
   0x5   :  { %24 = vsyncpa [#allocation6], 0 }
   0x6   :  { %25 = vsyncpa [#allocation9], 0 }
   0x7   :  { %26 = vsyncpa [#allocation12], 0 }
   0x8   :  { %27 = vsyncpa [#allocation15], 0 }
   0x9   :  { %28 = vsyncpa [#allocation18], 0 }
   0xa   :  { %29 = vsyncpa [#allocation21], 0 }
   0xb   :  { %30 = vsyncpa [#allocation24], 0 }
   0xc   :  { %31 = vsyncpa [#allocation7], 0  ;;  %s1998_s0 = smov [#allocation8]   ;;  %s1999_s20 = smov [#allocation11]  }
   0xd   :  { %s52_s30 = sshll.u32 %s1998_s0, 4  ;;  %s74_s21 = sshll.u32 %s1999_s20, 4  ;;  %s53_s30 = int_to_ptr.vmem [resolvable:$true] %s52_s30  ;;  %s75_s21 = int_to_ptr.vmem [resolvable:$true] %s74_s21 }
   0xe   :  { %s1710_s1 = scalar_lea.vmem %s53_s30, 16  ;;  %s1714_s22 = scalar_lea.vmem %s53_s30, 32 }
   0xf   :  { %p1711_p0 = scmp.ne.s32.totalorder %s53_s30, %s1710_s1  ;;  %p1715_p1 = scmp.lt.s32.totalorder %s53_s30, %s53_s30 }
  0x10   :  { %p1716_p2 = scmp.lt.s32.totalorder %s1714_s22, %s1710_s1 }
  0x12   :  { %p1717_p3 = por %p1716_p2, %p1715_p1 }
  0x14   :  { %p1718_p4 = pnand %p1717_p3, %p1711_p0 }
  0x16   :  { %1721 = shalt.err (!%p1718_p4)
}
  0x17   :  { %s2408_s24 = sld [smem:[#allocation37_spill]]  ;;  %s1730_s25 = scalar_lea.vmem %s75_s21, 16 }
  0x18   :  { %p1731_p5 = scmp.ne.s32.totalorder %s75_s21, %s1730_s25  ;;  %s1734_s3 = scalar_lea.vmem %s75_s21, 32 }
  0x19   :  { %p1735_p6 = scmp.lt.s32.totalorder %s75_s21, %s75_s21  ;;  %p1736_p7 = scmp.lt.s32.totalorder %s1734_s3, %s1730_s25 }
  0x1b   :  { %p1737_p8 = por %p1736_p7, %p1735_p6 }
  0x1d   :  { %55 = dma.hbm_to_vmem [thread:$0]  %s2408_s24, 16, %s53_s30, [#allocation9]  }
  0x1e   :  { %p1738_p9 = pnand %p1737_p8, %p1731_p5 }
  0x20   :  { %1741 = shalt.err (!%p1738_p9)
}
  0x21   :  { %77 = dma.hbm_to_vmem [thread:$0]  %s2387_s4, 16, %s75_s21, [#allocation12]  }
  0x22   :  { %s2000_s28 = smov [#allocation14]   ;;  %s2001_s0 = smov [#allocation17]  }
  0x23   :  { %s96_s29 = sshll.u32 %s2000_s28, 4  ;;  %s118_s20 = sshll.u32 %s2001_s0, 4  ;;  %s97_s29 = int_to_ptr.vmem [resolvable:$true] %s96_s29  ;;  %s119_s20 = int_to_ptr.vmem [resolvable:$true] %s118_s20 }
  0x24   :  { %s1750_s1 = scalar_lea.vmem %s97_s29, 16  ;;  %s1754_s30 = scalar_lea.vmem %s97_s29, 32 }
  0x25   :  { %p1751_p10 = scmp.ne.s32.totalorder %s97_s29, %s1750_s1  ;;  %p1755_p11 = scmp.lt.s32.totalorder %s97_s29, %s97_s29 }
  0x26   :  { %p1756_p12 = scmp.lt.s32.totalorder %s1754_s30, %s1750_s1 }
  0x28   :  { %p1757_p13 = por %p1756_p12, %p1755_p11 }
  0x2a   :  { %p1758_p0 = pnand %p1757_p13, %p1751_p10 }
  0x2c   :  { %1761 = shalt.err (!%p1758_p0)
}
  0x2d   :  { %99 = dma.hbm_to_vmem [thread:$0]  %s2389_s6, 16, %s97_s29, [#allocation15]  }
  0x2e   :  { %s1770_s23 = scalar_lea.vmem %s119_s20, 16  ;;  %s1774_s4 = scalar_lea.vmem %s119_s20, 32 }
  0x2f   :  { %p1771_p1 = scmp.ne.s32.totalorder %s119_s20, %s1770_s23  ;;  %p1775_p2 = scmp.lt.s32.totalorder %s119_s20, %s119_s20 }
  0x30   :  { %p1776_p3 = scmp.lt.s32.totalorder %s1774_s4, %s1770_s23 }
  0x32   :  { %p1777_p4 = por %p1776_p3, %p1775_p2 }
  0x34   :  { %p1778_p5 = pnand %p1777_p4, %p1771_p1 }
  0x36   :  { %1781 = shalt.err (!%p1778_p5)
}
  0x37   :  { %121 = dma.hbm_to_vmem [thread:$0]  %s2391_s8, 16, %s119_s20, [#allocation18]  }
  0x38   :  { %s2002_s25 = smov [#allocation20]  }
  0x39   :  { %s140_s3 = sshll.u32 %s2002_s25, 4  ;;  %s141_s3 = int_to_ptr.vmem [resolvable:$true] %s140_s3 }
  0x3a   :  { %s1790_s26 = scalar_lea.vmem %s141_s3, 128  ;;  %p1795_p7 = scmp.lt.s32.totalorder %s141_s3, %s141_s3 }
  0x3b   :  { %p1791_p6 = scmp.ne.s32.totalorder %s141_s3, %s1790_s26  ;;  %p1796_p8 = scmp.lt.s32.totalorder %s1790_s26, %s1790_s26 }
  0x3d   :  { %p1797_p9 = por %p1796_p8, %p1795_p7 }
  0x3f   :  { %p1798_p10 = pnand %p1797_p9, %p1791_p6 }
  0x41   :  { %1801 = shalt.err (!%p1798_p10)
}
  0x42   :  { %143 = dma.hbm_to_vmem [thread:$0]  %s2394_s11, 128, %s141_s3, [#allocation21]  }
  0x43   :  { %s2003_s28 = smov [#allocation23]   ;;  %s2004_s0 = smov [#allocation5]  }
  0x44   :  { %s161_s29 = sshll.u32 %s2003_s28, 4  ;;  %s37_s1 = sshll.u32 %s2004_s0, 4  ;;  %s162_s29 = int_to_ptr.vmem [resolvable:$true] %s161_s29  ;;  %s38_s1 = int_to_ptr.vmem [resolvable:$true] %s37_s1 }
  0x45   :  { %s1810_s8 = scalar_lea.vmem %s162_s29, 512  ;;  %p1815_p12 = scmp.lt.s32.totalorder %s162_s29, %s162_s29 }
  0x46   :  { %p1811_p11 = scmp.ne.s32.totalorder %s162_s29, %s1810_s8  ;;  %p1816_p13 = scmp.lt.s32.totalorder %s1810_s8, %s1810_s8 }
  0x48   :  { %p1817_p0 = por %p1816_p13, %p1815_p12 }
  0x4a   :  { %p1818_p1 = pnand %p1817_p0, %p1811_p11 }
  0x4c   :  { %1821 = shalt.err (!%p1818_p1)
}
  0x4d   :  { %s2005_s20 = smov 128   ;;  %s2006_s30 = smov 8  }
  0x4e   :  { %167 = dma.hbm_to_vmem [thread:$0]  %s2397_s14, 512, %s162_s29, [#allocation24], %s2005_s20, %s2005_s20, %s2006_s30  }
  0x4f   :  { %s1830_s11 = scalar_lea.vmem %s38_s1, 256  ;;  %p1835_p3 = scmp.lt.s32.totalorder %s38_s1, %s38_s1 }
  0x50   :  { %p1831_p2 = scmp.ne.s32.totalorder %s38_s1, %s1830_s11  ;;  %p1836_p4 = scmp.lt.s32.totalorder %s1830_s11, %s1830_s11 }
  0x52   :  { %p1837_p5 = por %p1836_p4, %p1835_p3 }
  0x54   :  { %p1838_p6 = pnand %p1837_p5, %p1831_p2 }
  0x56   :  { %1841 = shalt.err (!%p1838_p6)
}
  0x57   :  { %s2409_s21 = sld [smem:[#allocation35_spill]]  ;;  %s2007_s24 = smov [#allocation10]  }
  0x58   :  { %s61_s25 = sshll.u32 %s2007_s24, 4  ;;  %s2008_s3 = smov [#allocation13]   ;;  %s62_s25 = int_to_ptr.vmem [resolvable:$true] %s61_s25 }
  0x59   :  { %s83_s14 = sshll.u32 %s2008_s3, 4  ;;  %s1850_s26 = scalar_lea.vmem %s62_s25, 512  ;;  %s84_s14 = int_to_ptr.vmem [resolvable:$true] %s83_s14 }
  0x5a   :  { %p1851_p7 = scmp.ne.s32.totalorder %s62_s25, %s1850_s26  ;;  %p1855_p8 = scmp.lt.s32.totalorder %s62_s25, %s62_s25 }
  0x5b   :  { %p1856_p9 = scmp.lt.s32.totalorder %s1850_s26, %s1850_s26 }
  0x5d   :  { %43 = dma.hbm_to_vmem [thread:$0]  %s2409_s21, 256, %s38_s1, [#allocation6], %s2005_s20, %s2005_s20, %s2006_s30  }
  0x5e   :  { %p1857_p10 = por %p1856_p9, %p1855_p8 }
  0x60   :  { %p1858_p11 = pnand %p1857_p10, %p1851_p7 }
  0x62   :  { %1861 = shalt.err (!%p1858_p11)
}
  0x63   :  { %s2410_s28 = sld [smem:[#allocation38_spill]]  ;;  %s1870_s29 = scalar_lea.vmem %s84_s14, 512 }
  0x64   :  { %p1871_p12 = scmp.ne.s32.totalorder %s84_s14, %s1870_s29  ;;  %p1875_p13 = scmp.lt.s32.totalorder %s84_s14, %s84_s14 }
  0x65   :  { %p1876_p0 = scmp.lt.s32.totalorder %s1870_s29, %s1870_s29 }
  0x67   :  { %p1877_p1 = por %p1876_p0, %p1875_p13 }
  0x69   :  { %67 = dma.hbm_to_vmem [thread:$0]  %s2410_s28, 512, %s62_s25, [#allocation9], %s2005_s20, %s2005_s20, %s2006_s30  }
  0x6a   :  { %p1878_p2 = pnand %p1877_p1, %p1871_p12 }
  0x6c   :  { %1881 = shalt.err (!%p1878_p2)
}
  0x6d   :  { %89 = dma.hbm_to_vmem [thread:$0]  %s2388_s5, 512, %s84_s14, [#allocation12], %s2005_s20, %s2005_s20, %s2006_s30  }
  0x6e   :  { %s2009_s8 = smov [#allocation16]   ;;  %s2010_s2 = smov [#allocation19]  }
  0x6f   :  { %s105_s22 = sshll.u32 %s2009_s8, 4  ;;  %s130_s11 = sshll.u32 %s2010_s2, 4  ;;  %s106_s22 = int_to_ptr.vmem [resolvable:$true] %s105_s22  ;;  %s131_s11 = int_to_ptr.vmem [resolvable:$true] %s130_s11 }
  0x70   :  { %s1890_s23 = scalar_lea.vmem %s106_s22, 512  ;;  %p1895_p4 = scmp.lt.s32.totalorder %s106_s22, %s106_s22 }
  0x71   :  { %p1891_p3 = scmp.ne.s32.totalorder %s106_s22, %s1890_s23  ;;  %p1896_p5 = scmp.lt.s32.totalorder %s1890_s23, %s1890_s23 }
  0x73   :  { %p1897_p6 = por %p1896_p5, %p1895_p4 }
  0x75   :  { %p1898_p7 = pnand %p1897_p6, %p1891_p3 }
  0x77   :  { %1901 = shalt.err (!%p1898_p7)
}
  0x78   :  { %111 = dma.hbm_to_vmem [thread:$0]  %s2390_s7, 512, %s106_s22, [#allocation15], %s2005_s20, %s2005_s20, %s2006_s30  }
  0x79   :  { %s1910_s5 = scalar_lea.vmem %s131_s11, 16  ;;  %s1914_s24 = scalar_lea.vmem %s131_s11, 32 }
  0x7a   :  { %p1911_p8 = scmp.ne.s32.totalorder %s131_s11, %s1910_s5  ;;  %p1915_p9 = scmp.lt.s32.totalorder %s131_s11, %s131_s11 }
  0x7b   :  { %p1916_p10 = scmp.lt.s32.totalorder %s1914_s24, %s1910_s5 }
  0x7d   :  { %p1917_p11 = por %p1916_p10, %p1915_p9 }
  0x7f   :  { %p1918_p12 = pnand %p1917_p11, %p1911_p8 }
  0x81   :  { %1921 = shalt.err (!%p1918_p12)
}
  0x82   :  { %133 = dma.hbm_to_vmem [thread:$0]  %s2393_s10, 16, %s131_s11, [#allocation18]  }
  0x83   :  { %s2011_s14 = smov [#allocation22]   ;;  %s2012_s6 = smov [#allocation25]  }
  0x84   :  { %s150_s26 = sshll.u32 %s2011_s14, 4  ;;  %s175_s27 = sshll.u32 %s2012_s6, 4  ;;  %s151_s26 = int_to_ptr.vmem [resolvable:$true] %s150_s26  ;;  %s176_s27 = int_to_ptr.vmem [resolvable:$true] %s175_s27 }
  0x85   :  { %s1930_s28 = scalar_lea.vmem %s151_s26, 128  ;;  %p1935_p0 = scmp.lt.s32.totalorder %s151_s26, %s151_s26 }
  0x86   :  { %p1931_p13 = scmp.ne.s32.totalorder %s151_s26, %s1930_s28  ;;  %p1936_p1 = scmp.lt.s32.totalorder %s1930_s28, %s1930_s28 }
  0x88   :  { %p1937_p2 = por %p1936_p1, %p1935_p0 }
  0x8a   :  { %p1938_p3 = pnand %p1937_p2, %p1931_p13 }
  0x8c   :  { %1941 = shalt.err (!%p1938_p3)
}
  0x8d   :  { %153 = dma.hbm_to_vmem [thread:$0]  %s2395_s12, 128, %s151_s26, [#allocation21]  }
  0x8e   :  { %s1950_s0 = scalar_lea.vmem %s176_s27, 512  ;;  %p1955_p5 = scmp.lt.s32.totalorder %s176_s27, %s176_s27 }
  0x8f   :  { %p1951_p4 = scmp.ne.s32.totalorder %s176_s27, %s1950_s0  ;;  %p1956_p6 = scmp.lt.s32.totalorder %s1950_s0, %s1950_s0 }
  0x91   :  { %p1957_p7 = por %p1956_p6, %p1955_p5 }
  0x93   :  { %p1958_p8 = pnand %p1957_p7, %p1951_p4 }
  0x95   :  { %1961 = shalt.err (!%p1958_p8)
}
  0x96   :  { %181 = dma.hbm_to_vmem [thread:$0]  %s2399_s16, 512, %s176_s27, [#allocation24], %s2005_s20, %s2005_s20, %s2006_s30  }
  0x97   :  { %1982 = dma.done.wait [#allocation6], 256  }
  0x98   :  { %1983 = vsyncadd [#allocation6], 4294967040 }
  0x99   :  { %1984 = dma.done.wait [#allocation9], 528  }
  0x9a   :  { %1985 = vsyncadd [#allocation9], 4294966768 }
  0x9b   :  { %1986 = dma.done.wait [#allocation12], 528  }
  0x9c   :  { %1987 = vsyncadd [#allocation12], 4294966768 }
  0x9d   :  { %1988 = dma.done.wait [#allocation15], 528  }
  0x9e   :  { %1989 = vsyncadd [#allocation15], 4294966768 }
  0x9f   :  { %1990 = dma.done.wait [#allocation18], 32  }
  0xa0   :  { %1991 = vsyncadd [#allocation18], 4294967264 }
  0xa1   :  { %1992 = dma.done.wait [#allocation21], 256  }
  0xa2   :  { %1993 = vsyncadd [#allocation21], 4294967040 }
  0xa3   :  { %1994 = dma.done.wait [#allocation24], 1024  }
  0xa4   :  { %1995 = vsyncadd [#allocation24], 4294966272  ;;  %s2411_s22 = sld [smem:[#allocation36_spill]]  ;;  %v327_v1 = vld [vmem:[#allocation10 + $0x18] sm:$0xff]  ;;  %v326_v3 = vld [vmem:[#allocation10 + $0x10] sm:$0xff]  ;;  %vm240_vm0 = vcmask 261120  }
  0xa5   :  { %1552 = vmatprep.subr.mxu1 %v327_v1  ;;  %v325_v5 = vld [vmem:[#allocation10 + $0x8] sm:$0xff]  ;;  %v324_v7 = vld [vmem:[#allocation10] sm:$0xff]  ;;  %v2186_v9 = vld [vmem:[#allocation5 + $0x8] sm:$0xff]  ;;  %v2013_v59 = vmov 0.0   ;;  %vm809_vm1 = vcmask 64512   ;;  %vm2014_vm2 = vmmov 0  }
  0xa6   :  { %1553 = vmatpush3.msra.mxu1 %v327_v1  ;;  %v225_v8 = vld [vmem:[#allocation5] sm:$0xff]  ;;  %v419_v10 = vld [vmem:[#allocation13 + $0x18] sm:$0xff]  ;;  %v416_v16 = vld [vmem:[#allocation13] sm:$0xff] }
  0xa7   :  { %1554 = vmatprep.subr.mxu1 %v326_v3  ;;  %1549 = vmatprep.mubr.msk.f32.mxu0 %vm240_vm0, %v225_v8  ;;  %v507_v11 = vld [vmem:[#allocation16 + $0x18] sm:$0xff]  ;;  %v418_v12 = vld [vmem:[#allocation13 + $0x10] sm:$0xff]  ;;  %v417_v14 = vld [vmem:[#allocation13 + $0x8] sm:$0xff] }
  0xa8   :  { %1555 = vmatpush3.msra.mxu1 %v326_v3  ;;  %1560 = vmatprep.mubr.msk.f32.mxu1 %vm240_vm0, %v225_v8  ;;  %v506_v13 = vld [vmem:[#allocation16 + $0x10] sm:$0xff]  ;;  %v505_v15 = vld [vmem:[#allocation16 + $0x8] sm:$0xff]  ;;  %v504_v17 = vld [vmem:[#allocation16] sm:$0xff] }
  0xa9   :  { %1556 = vmatprep.subr.mxu1 %v325_v5  ;;  %v1441_v18 = vld [vmem:[#allocation8] ss:$0 sm:$0xff]  ;;  %v1444_v19 = vld [vmem:[#allocation11] ss:$0 sm:$0xff]  ;;  %v227_v20 = vld [vmem:[#allocation20] sm:$0xff] }
  0xaa   :  { %v232_v0 = vld [vmem:[%s2411_s22 + $0x18] sm:$0xff]  ;;  %v231_v2 = vld [vmem:[%s2411_s22 + $0x10] sm:$0xff]  ;;  %v230_v4 = vld [vmem:[%s2411_s22 + $0x8] sm:$0xff]  ;;  %1557 = vmatpush3.msra.mxu1 %v325_v5 }
  0xab   :  { %1541 = vmatprep.subr.mxu0 %v232_v0  ;;  %v229_v6 = vld [vmem:[%s2411_s22] sm:$0xff]  ;;  %1558 = vmatprep.subr.mxu1 %v324_v7  ;;  %v228_v22 = vld [vmem:[#allocation22] sm:$0xff]  ;;  %v2212_v57 = vld [vmem:[#allocation23 + $0x10] sm:$0xff] }
  0xac   :  { %1542 = vmatpush3.msra.mxu0 %v232_v0  ;;  %1559 = vmatpush3.msra.mxu1 %v324_v7  ;;  %v1447_v36 = vld [vmem:[#allocation14] ss:$0 sm:$0xff]  ;;  %v1450_v37 = vld [vmem:[#allocation17] ss:$0 sm:$0xff]  ;;  %v2203_v48 = vld [vmem:[#allocation23] sm:$0xff] }
  0xad   :  { %1543 = vmatprep.subr.mxu0 %v231_v2  ;;  %1561 = vmatmul.mubr.msk.f32.vlgmr.msra.gmra.mxu1 %vm240_vm0, %v2186_v9  ;;  %v2209_v56 = vld [vmem:[#allocation23 + $0x8] sm:$0xff]  ;;  %v2217_v60 = vld [vmem:[#allocation25 + $0x18] sm:$0xff]  ;;  %v2223_v63 = vld [vmem:[#allocation25 + $0x10] sm:$0xff] }
  0xae   :  { %1544 = vmatpush3.msra.mxu0 %v231_v2  ;;  %1574 = vmatprep.subr.mxu1 %v507_v11  ;;  %v2220_v62 = vld [vmem:[#allocation23 + $0x18] sm:$0xff]  ;;  %v2229_v1 = vld [vmem:[#allocation25 + $0x8] sm:$0xff]  ;;  %v2234_v2 = vld [vmem:[#allocation25] sm:$0xff] }
  0xaf   :  { %1545 = vmatprep.subr.mxu0 %v230_v4  ;;  %1575 = vmatpush3.msra.mxu1 %v507_v11  ;;  %v598_v5 = vld [vmem:[%s2392_s9 + $0x10] sm:$0xff]  ;;  %v596_v7 = vld [vmem:[%s2392_s9] sm:$0xff] }
  0xb0   :  { %1546 = vmatpush3.msra.mxu0 %v230_v4  ;;  %1576 = vmatprep.subr.mxu1 %v506_v13  ;;  %v599_v4 = vld [vmem:[%s2392_s9 + $0x18] sm:$0xff] }
  0xb1   :  { %1547 = vmatprep.subr.mxu0 %v229_v6  ;;  %1577 = vmatpush3.msra.mxu1 %v506_v13 }
  0xb2   :  { %1548 = vmatpush3.msra.mxu0 %v229_v6  ;;  %1578 = vmatprep.subr.mxu1 %v505_v15  ;;  %v597_v6 = vld [vmem:[%s2392_s9 + $0x8] sm:$0xff] }
  0xb3   :  { %1550 = vmatmul.mubr.msk.f32.vlgmr.msra.gmra.mxu0 %vm240_vm0, %v2186_v9  ;;  %1563 = vmatprep.subr.mxu0 %v419_v10 }
  0xb4   :  { %1564 = vmatpush3.msra.mxu0 %v419_v10  ;;  %1579 = vmatpush3.msra.mxu1 %v505_v15 }
  0xb5   :  { %1565 = vmatprep.subr.mxu0 %v418_v12  ;;  %1580 = vmatprep.subr.mxu1 %v504_v17 }
  0xb6   :  { %1566 = vmatpush3.msra.mxu0 %v418_v12  ;;  %1571 = vmatprep.mubr.msk.f32.mxu0 %vm240_vm0, %v225_v8 }
  0xb7   :  { %1567 = vmatprep.subr.mxu0 %v417_v14  ;;  %1581 = vmatpush3.msra.mxu1 %v504_v17 }
  0xb8   :  { %1568 = vmatpush3.msra.mxu0 %v417_v14  ;;  %1582 = vmatprep.mubr.msk.f32.mxu1 %vm240_vm0, %v225_v8 }
  0xb9   :  { %1569 = vmatprep.subr.mxu0 %v416_v16  ;;  %1583 = vmatmul.mubr.msk.f32.vlgmr.msra.gmra.mxu1 %vm240_vm0, %v2186_v9 }
  0xba   :  { %1570 = vmatpush3.msra.mxu0 %v416_v16 }
  0xbb   :  { %1572 = vmatmul.mubr.msk.f32.vlgmr.msra.gmra.mxu0 %vm240_vm0, %v2186_v9  ;;  %1585 = vmatprep.subr.mxu0 %v599_v4 }
  0xbc   :  { %1593 = vmatprep.mubr.msk.f32.mxu0 %vm240_vm0, %v225_v8  ;;  %1586 = vmatpush3.msra.mxu0 %v599_v4 }
  0xbd   :  { %1587 = vmatprep.subr.mxu0 %v598_v5 }
  0xbe   :  { %1588 = vmatpush3.msra.mxu0 %v598_v5 }
  0xbf   :  { %1589 = vmatprep.subr.mxu0 %v597_v6 }
  0xc0   :  { %1590 = vmatpush3.msra.mxu0 %v597_v6  ;;  %v2289_v6 = vld [vmem:[%s2396_s13 + $0x18] sm:$0xff] }
  0xc1   :  { %1591 = vmatprep.subr.mxu0 %v596_v7 }
  0xc2   :  { %1592 = vmatpush3.msra.mxu0 %v596_v7 }
  0xc3   :  { %1594 = vmatmul.mubr.msk.f32.vlgmr.msra.gmra.mxu0 %vm240_vm0, %v2186_v9 }
 0x16d   :  { %v1562_v23 = vpop.f32.mrf.mxu1 }
 0x16e   :  { %v407_v25 = vadd.f32 %v1562_v23, %v1444_v19 }
 0x16f   :  { %v401_v27 = vpop.f32.mrf.mxu1 }
 0x170   :  { %v411_v29 = vmul.f32 %v407_v25, %v228_v22  ;;  %v402_v31 = vadd.f32 %v1444_v19, %v401_v27 }
 0x172   :  { %v410_v34 = vmul.f32 %v402_v31, %v228_v22 }
 0x173   :  { %v1551_v21 = vpop.f32.mrf.mxu0 }
 0x174   :  { %v319_v24 = vadd.f32 %v1551_v21, %v1441_v18 }
 0x175   :  { %v313_v26 = vpop.f32.mrf.mxu0 }
 0x176   :  { %v323_v28 = vmul.f32 %v319_v24, %v227_v20  ;;  %v314_v30 = vadd.f32 %v1441_v18, %v313_v26 }
 0x178   :  { %v413_v32 = vadd.f32 %v411_v29, %v323_v28  ;;  %v322_v33 = vmul.f32 %v314_v30, %v227_v20 }
 0x179   :  { %v1584_v39 = vpop.f32.mrf.mxu1 }
 0x17a   :  { %415 = vst.msk [vmem:[#allocation2 + $0x8] sm:$0xff] %vm240_vm0, %v413_v32  ;;  %v412_v35 = vadd.f32 %v410_v34, %v322_v33  ;;  %v587_v41 = vadd.f32 %v1584_v39, %v1450_v37 }
 0x17b   :  { %v1573_v38 = vpop.f32.mrf.mxu0  ;;  %v581_v43 = vpop.f32.mrf.mxu1 }
 0x17c   :  { %414 = vst.msk [vmem:[#allocation2] sm:$0xff] %vm240_vm0, %v412_v35  ;;  %v499_v40 = vadd.f32 %v1573_v38, %v1447_v36  ;;  %v591_v45 = vmul.f32 %v587_v41, %v228_v22  ;;  %v582_v47 = vadd.f32 %v1450_v37, %v581_v43  ;;  %v1453_v37 = vld [vmem:[#allocation19] ss:$0 sm:$0xff] }
 0x17d   :  { %v493_v42 = vpop.f32.mrf.mxu0 }
 0x17e   :  { %v503_v44 = vmul.f32 %v499_v40, %v227_v20  ;;  %v494_v46 = vadd.f32 %v1447_v36, %v493_v42  ;;  %v590_v51 = vmul.f32 %v582_v47, %v228_v22 }
 0x180   :  { %v593_v49 = vadd.f32 %v591_v45, %v503_v44  ;;  %v502_v50 = vmul.f32 %v494_v46, %v227_v20 }
 0x182   :  { %595 = vst.msk [vmem:[#allocation3 + $0x8] sm:$0xff] %vm240_vm0, %v593_v49  ;;  %v592_v53 = vadd.f32 %v590_v51, %v502_v50  ;;  %v2270_v49 = vld [vmem:[%s2396_s13] sm:$0xff] }
 0x183   :  { %v702_v52 = vld [vmem:[#allocation2] sm:$0xff]  ;;  %v1595_v36 = vpop.f32.mrf.mxu0 }
 0x184   :  { %v705_v54 = vmul.f32 %v702_v52, %v2203_v48  ;;  %594 = vst.msk [vmem:[#allocation3] sm:$0xff] %vm240_vm0, %v592_v53  ;;  %v706_v58 = vmul.f32 %v702_v52, %v2209_v56  ;;  %v707_v61 = vmul.f32 %v702_v52, %v2212_v57  ;;  %v708_v0 = vmul.f32 %v702_v52, %v2220_v62  ;;  %v2276_v53 = vld [vmem:[%s2396_s13 + $0x8] sm:$0xff] }
 0x185   :  { %v679_v38 = vadd.f32 %v1595_v36, %v1453_v37  ;;  %v673_v39 = vpop.f32.mrf.mxu0 }
 0x186   :  { %1598 = vmatprep.mubr.msk.f32.mxu1 %vm240_vm0, %v705_v54  ;;  %v674_v40 = vadd.f32 %v1453_v37, %v673_v39 }
 0x187   :  { %683 = vst.msk [vmem:[#allocation4 + $0x8] sm:$0xff] %vm240_vm0, %v679_v38 }
 0x188   :  { %682 = vst.msk [vmem:[#allocation4] sm:$0xff] %vm240_vm0, %v674_v40 }
 0x189   :  { %v2239_v3 = vld [vmem:[#allocation3 + $0x8] sm:$0xff] }
 0x18b   :  { %v703_v55 = vld [vmem:[#allocation3] sm:$0xff] }
 0x18c   :  { %1596 = vmatprep.subr.msk.mxu1 %vm240_vm0, %v703_v55 }
 0x18d   :  { %1597 = vmatpush3.xpose.msk.msra.mxu1 %vm240_vm0, %v703_v55 }
 0x18e   :  { %1612 = vmatprep.subr.mxu1 %v2013_v59  ;;  %v1081_v42 = vld [vmem:[#allocation4 + $0x8] sm:$0xff] }
 0x18f   :  { %v704_v41 = vld [vmem:[#allocation4] sm:$0xff] }
 0x190   :  { %1599 = vmatmul.mubr.msk.f32.vlgmr.msra.gmra.mxu1 %vm240_vm0, %v706_v58  ;;  %1604 = vmatprep.subr.mxu0 %v704_v41  ;;  %v2282_v58 = vld [vmem:[%s2396_s13 + $0x10] sm:$0xff] }
 0x191   :  { %1601 = vmatprep.mubr.msk.f32.mxu1 %vm240_vm0, %v707_v61  ;;  %1613 = vmatpush3.msra.mxu1 %v2217_v60 }
 0x192   :  { %1614 = vmatprep.subr.mxu1 %v2013_v59  ;;  %1605 = vmatpush3.msra.mxu0 %v704_v41 }
 0x193   :  { %1615 = vmatpush3.msra.mxu1 %v2223_v63  ;;  %1631 = vmatprep.subr.mxu0 %v1081_v42 }
 0x194   :  { %1602 = vmatmul.mubr.msk.f32.gmra.mxu1 %vm240_vm0, %v708_v0  ;;  %1616 = vmatprep.subr.mxu1 %v2013_v59 }
 0x195   :  { %1617 = vmatpush3.msra.mxu1 %v2229_v1  ;;  %1620 = vmatprep.mubr.msk.f32.mxu1 %vm2014_vm2, %v2013_v59 }
 0x196   :  { %1618 = vmatprep.subr.mxu1 %v2013_v59 }
 0x197   :  { %1619 = vmatpush3.msra.mxu1 %v2234_v2 }
 0x198   :  { %1623 = vmatprep.subr.msk.mxu1 %vm240_vm0, %v2239_v3 }
 0x250   :  { %v1600_v8 = vpop.f32.mrf.mxu1 }
 0x251   :  { %v813_v14 = vsel %vm809_vm1, %v1600_v8, -inf }
 0x252   :  { %v790_v10 = vpop.f32.mrf.mxu1 }
 0x253   :  { %v810_v11 = vsel %vm809_vm1, %v790_v10, -inf }
 0x254   :  { %811 = vmax.xlane.f32.xlu0 %v810_v11  ;;  %v1603_v12 = vpop.f32.mrf.mxu1 }
 0x255   :  { %v819_v16 = vsel %vm809_vm1, %v1603_v12, -inf }
 0x256   :  { %v800_v13 = vpop.f32.mrf.mxu1 }
 0x257   :  { %v816_v15 = vsel %vm809_vm1, %v800_v13, -inf }
 0x258   :  { %814 = vmax.xlane.f32.xlu0 %v813_v14  ;;  %817 = vmax.xlane.f32.xlu1 %v816_v15 }
 0x25c   :  { %820 = vmax.xlane.f32.xlu1 %v819_v16  ;;  %v2312_v16 = vld [vmem:[%s2398_s15 + $0x3] ss:$0 sm:$0xff] }
 0x2dd   :  { %v812_v17 = vpop.xlane.xlu0 %811 }
 0x2de   :  { %v822_v18 = vsub.f32 %v790_v10, %v812_v17  ;;  %v2300_v10 = vld [vmem:[%s2398_s15 + $0x1] ss:$0 sm:$0xff] }
 0x2e0   :  { %v826_v9 = vmul.f32 1.442695, %v822_v18  ;;  %v2317_v18 = vld [vmem:[%s2398_s15 + $0x2] ss:$0 sm:$0xff] }
 0x2e1   :  { %v815_v19 = vpop.xlane.xlu0 %814  ;;  %v818_v20 = vpop.xlane.xlu1 %817 }
 0x2e2   :  { %1670 = vpow2.f32 %v826_v9  ;;  %v823_v21 = vsub.f32 %v1600_v8, %v815_v19  ;;  %v824_v22 = vsub.f32 %v800_v13, %v818_v20 }
 0x2e4   :  { %v828_v23 = vmul.f32 1.442695, %v823_v21  ;;  %v830_v24 = vmul.f32 1.442695, %v824_v22 }
 0x2e5   :  { %v821_v25 = vpop.xlane.xlu1 %820 }
 0x2e6   :  { %1672 = vpow2.f32 %v828_v23  ;;  %v825_v26 = vsub.f32 %v1603_v12, %v821_v25  ;;  %v2305_v12 = vld [vmem:[%s2398_s15] ss:$0 sm:$0xff] }
 0x2e7   :  { %1674 = vpow2.f32 %v830_v24 }
 0x2e8   :  { %v832_v27 = vmul.f32 1.442695, %v825_v26  ;;  %v1077_v26 = vld [vmem:[#allocation2 + $0x8] sm:$0xff] }
 0x2ea   :  { %1676 = vpow2.f32 %v832_v27 }
 0x2ef   :  { %v1671_v28 = vpop.eup %1670 }
 0x2f0   :  { %v834_v29 = vsel %vm809_vm1, %v1671_v28, 0.0 }
 0x2f1   :  { %835 = vadd.xlane.f32.xlu0 %v834_v29  ;;  %v1082_v29 = vmul.f32 %v1077_v26, %v2203_v48  ;;  %v1085_v48 = vmul.f32 %v1077_v26, %v2220_v62 }
 0x2f3   :  { %v1673_v30 = vpop.eup %1672 }
 0x2f4   :  { %v1675_v31 = vpop.eup %1674  ;;  %v837_v32 = vsel %vm809_vm1, %v1673_v30, 0.0 }
 0x2f5   :  { %838 = vadd.xlane.f32.xlu1 %v837_v32  ;;  %v840_v33 = vsel %vm809_vm1, %v1675_v31, 0.0 }
 0x2f6   :  { %841 = vadd.xlane.f32.xlu0 %v840_v33 }
 0x2f7   :  { %v1677_v34 = vpop.eup %1676 }
 0x2f8   :  { %v843_v35 = vsel %vm809_vm1, %v1677_v34, 0.0 }
 0x2f9   :  { %844 = vadd.xlane.f32.xlu1 %v843_v35 }
 0x37a   :  { %v836_v43 = vpop.xlane.xlu0 %835 }
 0x37b   :  { %1678 = vrcp.f32 %v836_v43 }
 0x37e   :  { %v839_v44 = vpop.xlane.xlu1 %838 }
 0x37f   :  { %v842_v45 = vpop.xlane.xlu0 %841  ;;  %1680 = vrcp.f32 %v839_v44 }
 0x380   :  { %1682 = vrcp.f32 %v842_v45 }
 0x382   :  { %v845_v46 = vpop.xlane.xlu1 %844 }
 0x383   :  { %1684 = vrcp.f32 %v845_v46 }
 0x388   :  { %v1679_v47 = vpop.eup %1678 }
 0x389   :  { %v850_v50 = vmul.f32 %v1679_v47, %v1671_v28 }
 0x38b   :  { %v854_v51 = vmul.f32 %v850_v50, %v2270_v49 }
 0x38c   :  { %v1681_v52 = vpop.eup %1680 }
 0x38d   :  { %v1683_v54 = vpop.eup %1682  ;;  %1606 = vmatprep.mubr.msk.f32.mxu0 %vm809_vm1, %v854_v51  ;;  %v851_v55 = vmul.f32 %v1681_v52, %v1673_v30  ;;  %v1083_v30 = vmul.f32 %v1077_v26, %v2209_v56 }
 0x38e   :  { %v852_v61 = vmul.f32 %v1683_v54, %v1675_v31  ;;  %v1084_v31 = vmul.f32 %v1077_v26, %v2212_v57 }
 0x38f   :  { %v855_v0 = vmul.f32 %v851_v55, %v2276_v53 }
 0x390   :  { %v1685_v4 = vpop.eup %1684  ;;  %v856_v5 = vmul.f32 %v852_v61, %v2282_v58 }
 0x391   :  { %1607 = vmatmul.mubr.msk.f32.vlgmr.msra.gmra.mxu0 %vm809_vm1, %v855_v0  ;;  %v853_v7 = vmul.f32 %v1685_v4, %v1677_v34  ;;  %v701_v0 = vld [vmem:[%s2401_s18] sm:$0xff] }
 0x392   :  { %1632 = vmatpush3.msra.mxu0 %v1081_v42  ;;  %1609 = vmatprep.mubr.msk.f32.mxu0 %vm809_vm1, %v856_v5 }
 0x393   :  { %v857_v8 = vmul.f32 %v853_v7, %v2289_v6 }
 0x395   :  { %1610 = vmatmul.mubr.msk.f32.gmra.mxu0 %vm809_vm1, %v857_v8 }
 0x451   :  { %v1608_v11 = vpop.f32.mrf.mxu0 }
 0x452   :  { %v980_v14 = vmul.f32 %v1608_v11, %v2300_v10  ;;  %v1469_v11 = vld [vmem:[%s2400_s17] ss:$0 sm:$0xff]  ;;  %s2016_s17 = smov [#allocation26]  }
 0x453   :  { %v936_v13 = vpop.f32.mrf.mxu0  ;;  %s1423_s18 = sshll.u32 %s2016_s17, 4  ;;  %s1424_s18 = int_to_ptr.vmem [resolvable:$true] %s1423_s18 }
 0x454   :  { %v979_v15 = vmul.f32 %v2305_v12, %v936_v13  ;;  %v984_v20 = vsel %vm240_vm0, %v980_v14, 0.0  ;;  %s1962_s25 = scalar_lea.vmem %s1424_s18, 256  ;;  %p1967_p10 = scmp.lt.s32.totalorder %s1424_s18, %s1424_s18 }
 0x455   :  { %v1611_v17 = vpop.f32.mrf.mxu0  ;;  %p1963_p9 = scmp.ne.s32.totalorder %s1424_s18, %s1962_s25  ;;  %p1968_p11 = scmp.lt.s32.totalorder %s1962_s25, %s1962_s25 }
 0x456   :  { %v983_v9 = vsel %vm240_vm0, %v979_v15, 0.0  ;;  %v982_v21 = vmul.f32 %v1611_v17, %v2312_v16 }
 0x457   :  { %v946_v19 = vpop.f32.mrf.mxu0  ;;  %v985_v23 = vadd.f32 %v984_v20, %v983_v9  ;;  %p1969_p12 = por %p1968_p11, %p1967_p10 }
 0x458   :  { %v981_v22 = vmul.f32 %v2317_v18, %v946_v19  ;;  %v988_v27 = vsel %vm240_vm0, %v982_v21, 0.0 }
 0x459   :  { %p1970_p13 = pnand %p1969_p12, %p1963_p9 }
 0x45a   :  { %v986_v24 = vsel %vm240_vm0, %v981_v22, 0.0 }
 0x45b   :  { %v987_v25 = vadd.f32 %v986_v24, %v985_v23 }
 0x45d   :  { %v989_v28 = vadd.f32 %v988_v27, %v987_v25 }
 0x45f   :  { %1621 = vmatmul.mubr.msk.f32.vlgmr.msra.gmra.mxu1 %vm240_vm0, %v989_v28 }
 0x460   :  { %1624 = vmatpush3.xpose.msk.msra.mxu1 %vm240_vm0, %v2239_v3  ;;  %1625 = vmatprep.mubr.msk.f32.mxu1 %vm240_vm0, %v1082_v29 }
 0x461   :  { %1639 = vmatprep.subr.mxu1 %v2013_v59 }
 0x463   :  { %1626 = vmatmul.mubr.msk.f32.vlgmr.msra.gmra.mxu1 %vm240_vm0, %v1083_v30 }
 0x464   :  { %1628 = vmatprep.mubr.msk.f32.mxu1 %vm240_vm0, %v1084_v31  ;;  %1640 = vmatpush3.msra.mxu1 %v2217_v60 }
 0x465   :  { %1641 = vmatprep.subr.mxu1 %v2013_v59 }
 0x466   :  { %1642 = vmatpush3.msra.mxu1 %v2223_v63 }
 0x467   :  { %1629 = vmatmul.mubr.msk.f32.gmra.mxu1 %vm240_vm0, %v1085_v48  ;;  %1643 = vmatprep.subr.mxu1 %v2013_v59 }
 0x468   :  { %1644 = vmatpush3.msra.mxu1 %v2229_v1  ;;  %1647 = vmatprep.mubr.msk.f32.mxu1 %vm2014_vm2, %v2013_v59 }
 0x469   :  { %1645 = vmatprep.subr.mxu1 %v2013_v59  ;;  %v2015_v59 = vmov 0  }
 0x46a   :  { %1646 = vmatpush3.msra.mxu1 %v2234_v2  ;;  %1669 = vset.pattern.permute.xlu0 %v2015_v59 }
 0x51f   :  { %v1065_v56 = vpop.f32.mrf.mxu1 }
 0x520   :  { %v1066_v13 = vadd.f32 %v1469_v11, %v1065_v56 }
 0x521   :  { %v1622_v57 = vpop.f32.mrf.mxu1 }
 0x523   :  { %v1627_v60 = vpop.f32.mrf.mxu1 }
 0x524   :  { %v1189_v62 = vsel %vm809_vm1, %v1627_v60, -inf }
 0x525   :  { %1190 = vmax.xlane.f32.xlu1 %v1189_v62  ;;  %v1167_v63 = vpop.f32.mrf.mxu1 }
 0x526   :  { %v1186_v3 = vsel %vm809_vm1, %v1167_v63, -inf }
 0x527   :  { %1187 = vmax.xlane.f32.xlu0 %v1186_v3  ;;  %v1630_v32 = vpop.f32.mrf.mxu1 }
 0x528   :  { %v1195_v1 = vsel %vm809_vm1, %v1630_v32, -inf }
 0x529   :  { %1196 = vmax.xlane.f32.xlu1 %v1195_v1  ;;  %v1177_v33 = vpop.f32.mrf.mxu1 }
 0x52a   :  { %v1192_v34 = vsel %vm809_vm1, %v1177_v33, -inf }
 0x52b   :  { %1193 = vmax.xlane.f32.xlu0 %v1192_v34 }
 0x5ae   :  { %v1191_v2 = vpop.xlane.xlu1 %1190 }
 0x5af   :  { %v1199_v35 = vsub.f32 %v1627_v60, %v1191_v2 }
 0x5b0   :  { %v1188_v36 = vpop.xlane.xlu0 %1187 }
 0x5b1   :  { %v1204_v37 = vmul.f32 1.442695, %v1199_v35  ;;  %v1198_v38 = vsub.f32 %v1167_v63, %v1188_v36 }
 0x5b2   :  { %v1197_v39 = vpop.xlane.xlu1 %1196 }
 0x5b3   :  { %1686 = vpow2.f32 %v1204_v37  ;;  %v1202_v40 = vmul.f32 1.442695, %v1198_v38  ;;  %v1201_v41 = vsub.f32 %v1630_v32, %v1197_v39 }
 0x5b4   :  { %v1194_v42 = vpop.xlane.xlu0 %1193 }
 0x5b5   :  { %1688 = vpow2.f32 %v1202_v40  ;;  %v1208_v43 = vmul.f32 1.442695, %v1201_v41  ;;  %v1200_v44 = vsub.f32 %v1177_v33, %v1194_v42 }
 0x5b7   :  { %1690 = vpow2.f32 %v1208_v43  ;;  %v1206_v45 = vmul.f32 1.442695, %v1200_v44 }
 0x5b9   :  { %1692 = vpow2.f32 %v1206_v45 }
 0x5c0   :  { %v1687_v46 = vpop.eup %1686 }
 0x5c1   :  { %v1213_v47 = vsel %vm809_vm1, %v1687_v46, 0.0 }
 0x5c2   :  { %v1689_v50 = vpop.eup %1688  ;;  %1214 = vadd.xlane.f32.xlu1 %v1213_v47 }
 0x5c3   :  { %v1210_v51 = vsel %vm809_vm1, %v1689_v50, 0.0 }
 0x5c4   :  { %v1691_v52 = vpop.eup %1690  ;;  %1211 = vadd.xlane.f32.xlu0 %v1210_v51 }
 0x5c5   :  { %v1219_v54 = vsel %vm809_vm1, %v1691_v52, 0.0 }
 0x5c6   :  { %v1693_v55 = vpop.eup %1692  ;;  %1220 = vadd.xlane.f32.xlu1 %v1219_v54 }
 0x5c7   :  { %v1216_v61 = vsel %vm809_vm1, %v1693_v55, 0.0 }
 0x5c8   :  { %1217 = vadd.xlane.f32.xlu0 %v1216_v61 }
 0x5de   :  { %1071 = vperm.xlu0 %1669, %v701_v0  }
 0x64b   :  { %v1215_v4 = vpop.xlane.xlu1 %1214 }
 0x64c   :  { %1694 = vrcp.f32 %v1215_v4 }
 0x64d   :  { %v1212_v5 = vpop.xlane.xlu0 %1211 }
 0x64e   :  { %1696 = vrcp.f32 %v1212_v5 }
 0x64f   :  { %v1221_v7 = vpop.xlane.xlu1 %1220 }
 0x650   :  { %1698 = vrcp.f32 %v1221_v7 }
 0x651   :  { %v1218_v8 = vpop.xlane.xlu0 %1217 }
 0x652   :  { %1700 = vrcp.f32 %v1218_v8 }
 0x659   :  { %v1695_v14 = vpop.eup %1694  ;;  %v1072_v15 = vpop.permute.xlu0 %1071 }
 0x65a   :  { %v1074_v17 = vmul.f32 %v1072_v15, %v1066_v13  ;;  %v1227_v19 = vmul.f32 %v1695_v14, %v1687_v46 }
 0x65b   :  { %v1697_v9 = vpop.eup %1696 }
 0x65c   :  { %1075 = vst [vmem:[#allocation26] sm:$0xff] %v1074_v17  ;;  %v1226_v20 = vmul.f32 %v1697_v9, %v1689_v50  ;;  %v1231_v24 = vmul.f32 %v1227_v19, %v2276_v53 }
 0x65d   :  { %v1699_v21 = vpop.eup %1698 }
 0x65e   :  { %v1230_v22 = vmul.f32 %v1226_v20, %v2270_v49  ;;  %v1229_v25 = vmul.f32 %v1699_v21, %v1691_v52 }
 0x65f   :  { %v1701_v23 = vpop.eup %1700 }
 0x660   :  { %1633 = vmatprep.mubr.msk.f32.mxu0 %vm809_vm1, %v1230_v22  ;;  %v1228_v26 = vmul.f32 %v1701_v23, %v1693_v55  ;;  %v1233_v28 = vmul.f32 %v1229_v25, %v2289_v6 }
 0x661   :  { %1634 = vmatmul.mubr.msk.f32.vlgmr.msra.gmra.mxu0 %vm809_vm1, %v1231_v24 }
 0x662   :  { %v1232_v27 = vmul.f32 %v1228_v26, %v2282_v58 }
 0x664   :  { %1636 = vmatprep.mubr.msk.f32.mxu0 %vm809_vm1, %v1232_v27 }
 0x665   :  { %1637 = vmatmul.mubr.msk.f32.gmra.mxu0 %vm809_vm1, %v1233_v28 }
 0x721   :  { %v1635_v29 = vpop.f32.mrf.mxu0 }
 0x722   :  { %v1332_v49 = vmul.f32 %v1635_v29, %v2300_v10 }
 0x723   :  { %v1312_v30 = vpop.f32.mrf.mxu0 }
 0x724   :  { %v1331_v53 = vmul.f32 %v2305_v12, %v1312_v30  ;;  %v1336_v57 = vsel %vm240_vm0, %v1332_v49, 0.0 }
 0x725   :  { %v1638_v31 = vpop.f32.mrf.mxu0 }
 0x726   :  { %v1335_v48 = vsel %vm240_vm0, %v1331_v53, 0.0  ;;  %v1334_v58 = vmul.f32 %v1638_v31, %v2312_v16 }
 0x727   :  { %v1322_v56 = vpop.f32.mrf.mxu0  ;;  %v1337_v60 = vadd.f32 %v1336_v57, %v1335_v48 }
 0x728   :  { %v1333_v6 = vmul.f32 %v2317_v18, %v1322_v56  ;;  %v1340_v3 = vsel %vm240_vm0, %v1334_v58, 0.0 }
 0x72a   :  { %v1338_v62 = vsel %vm240_vm0, %v1333_v6, 0.0 }
 0x72b   :  { %v1339_v63 = vadd.f32 %v1338_v62, %v1337_v60 }
 0x72d   :  { %v1341_v32 = vadd.f32 %v1340_v3, %v1339_v63 }
 0x72f   :  { %1648 = vmatmul.mubr.msk.f32.vlgmr.msra.gmra.mxu1 %vm240_vm0, %v1341_v32 }
 0x7ef   :  { %v1411_v10 = vpop.f32.mrf.mxu1 }
 0x7f0   :  { %v1412_v12 = vadd.f32 %v1469_v11, %v1411_v10 }
 0x7f1   :  { %v1649_v1 = vpop.f32.mrf.mxu1 }
 0x7f2   :  { %v1415_v33 = vmul.f32 %v1412_v12, %v1072_v15 }
 0x7f4   :  { %1417 = vst [vmem:[#allocation26 + $0x8] sm:$0xff] %v1415_v33 }
 0x7f5   :  { %1973 = shalt.err (!%p1970_p13)
}
 0x7f6   :  { %1429 = dma.vmem_to_hbm [thread:$0]  %s1424_s18, 256, %s2402_s19, [#allocation7], %s2005_s20, %s2005_s20, %s2006_s30  }
 0x7f7   :  { %1996 = dma.done.wait [#allocation7], 256  }
 0x7f8   :  { %1997 = vsyncadd [#allocation7], 4294967040 }
 0x7f9   :  { %1433 = vsyncpa [#allocation6], 1 }
 0x7fa   :  { %1434 = vsyncpa [#allocation9], 1 }
 0x7fb   :  { %1435 = vsyncpa [#allocation12], 1 }
 0x7fc   :  { %1436 = vsyncpa [#allocation15], 1 }
 0x7fd   :  { %1437 = vsyncpa [#allocation18], 1 }
 0x7fe   :  { %1438 = vsyncpa [#allocation21], 1 }
 0x7ff   :  { %1439 = vsyncpa [#allocation24], 1 }
 0x800   :  { %1440 = vsyncpa [#allocation7], 1 }

</bundles_post_ra>
